<compile_context>
chip_gen: v6e
topology: v6e:2x2x1
jax: 0.10.0
libtpu: 0.0.40
codegen_flags: <defaults>
</compile_context>

<pallas_src>
import functools

import jax
import jax.numpy as jnp
from jax.experimental import pallas as pl
from jax.experimental.pallas import tpu as pltpu


def _round_up(x, m):
    return ((x + m - 1) // m) * m


def _num_tensorcores():
    """Generation-aware TensorCore count (v7x: 2; v5e/v6e: 1). Safe fallback 1."""
    try:
        return max(1, int(getattr(jax.devices()[0], "num_cores", 1)))
    except Exception:
        return 1


def _single_step_loss_kernel(xa_ref, tgt_ref,
                             w1t_ref, b1_ref,
                             w2t_ref, b2_ref,
                             w3t_ref, b3_ref,
                             psum_ref,
                             acc_ref,
                             *, tiles_per_core, batch_tile, batch_size, needs_mask):
    c = pl.program_id(0)   # core axis ("parallel")
    i = pl.program_id(1)   # batch-tile axis ("arbitrary") -> accumulator

    @pl.when(i == 0)
    def _init():
        psum_ref[...] = jnp.zeros_like(psum_ref)
        acc_ref[...] = jnp.zeros_like(acc_ref)

    # Layer 1: single dense matmul on the packed [state || action]^T stream.
    # (hidden, S+A) @ (S+A, bt) -> (hidden, bt), f32 accumulate on the MXU.
    h1 = jnp.dot(w1t_ref[...], xa_ref[...], preferred_element_type=jnp.float32)
    h1 = jnp.maximum(h1 + b1_ref[...], 0.0)

    # Layer 2: (hidden, hidden) @ (hidden, bt)
    h2 = jnp.dot(w2t_ref[...], h1.astype(w2t_ref.dtype),
                 preferred_element_type=jnp.float32)
    h2 = jnp.maximum(h2 + b2_ref[...], 0.0)

    # Layer 3 (prediction): (S, hidden) @ (hidden, bt)
    pred = jnp.dot(w3t_ref[...], h2.astype(w3t_ref.dtype),
                   preferred_element_type=jnp.float32) + b3_ref[...]

    diff = pred - tgt_ref[...]           # target stays f32 (never feeds the MXU)
    sq = diff * diff

    if needs_mask:
        # Statically gated: only emitted when B is not a multiple of the padded
        # extent.  Zero-padded batch columns must not pollute the global sum.
        col = (jax.lax.broadcasted_iota(jnp.int32, sq.shape, 1)
               + (c * tiles_per_core + i) * batch_tile)
        sq = jnp.where(col < batch_size, sq, 0.0)

    # Steady state: elementwise f32 accumulate only (pure VPU); the cross-lane
    # reduction is deferred to the finalize step.
    acc_ref[...] += sq

    @pl.when(i == tiles_per_core - 1)
    def _finalize():
        # One XLU reduce per core, broadcast into the lane-dense (1,8,128) block.
        psum_ref[...] += jnp.sum(acc_ref[...])


def single_step_loss(params, state, action, target_state, *,
                     batch_tile=2048, compute_dtype=jnp.bfloat16):
    """Pallas implementation of SingleStepLoss.forward with the HW3 MLP + MSE."""
    w1, b1, w2, b2, w3, b3 = params
    B, state_dim = state.shape
    action_dim = action.shape[1]
    hidden = w1.shape[1]
    in_dim = state_dim + action_dim
    assert w1.shape[0] == in_dim

    ncores = _num_tensorcores()

    # Clamp the tile so phantom padded rows stay bounded; keep it 128-aligned
    # (lane dimension of the feature-major blocks).
    per_core = pl.cdiv(B, ncores)
    batch_tile = max(128, min(batch_tile, _round_up(per_core, 128)))
    tiles_per_core = pl.cdiv(per_core, batch_tile)
    b_pad = ncores * tiles_per_core * batch_tile
    needs_mask = (b_pad != B)

    # Feature-major, packed input: one (S+A, B_pad) stream feeds layer 1.
    xa = jnp.concatenate([state, action], axis=1).astype(compute_dtype).T
    tgt = target_state.astype(jnp.float32).T          # f32, never hits the MXU
    if needs_mask:
        xa = jnp.pad(xa, ((0, 0), (0, b_pad - B)))
        tgt = jnp.pad(tgt, ((0, 0), (0, b_pad - B)))

    # Transposed weights (MXU LHS) and column biases; DMA'd once, VMEM-resident.
    w1t = w1.T.astype(compute_dtype)                  # (hidden, S+A)
    w2t = w2.T.astype(compute_dtype)                  # (hidden, hidden)
    w3t = w3.T.astype(compute_dtype)                  # (S, hidden)
    b1c = b1.reshape(hidden, 1).astype(jnp.float32)
    b2c = b2.reshape(hidden, 1).astype(jnp.float32)
    b3c = b3.reshape(state_dim, 1).astype(jnp.float32)

    def data_spec(rows):
        return pl.BlockSpec((rows, batch_tile),
                            lambda c, i: (0, c * tiles_per_core + i))

    def resident(shape):
        return pl.BlockSpec(shape, lambda c, i: (0, 0))

    kernel = functools.partial(_single_step_loss_kernel,
                               tiles_per_core=tiles_per_core,
                               batch_tile=batch_tile,
                               batch_size=B,
                               needs_mask=needs_mask)

    partials = pl.pallas_call(
        kernel,
        out_shape=jax.ShapeDtypeStruct((ncores, 8, 128), jnp.float32),
        grid=(ncores, tiles_per_core),
        in_specs=[
            data_spec(in_dim),               # packed [state || action]^T
            data_spec(state_dim),            # target^T (f32)
            resident((hidden, in_dim)),      # W1^T
            resident((hidden, 1)),           # b1
            resident((hidden, hidden)),      # W2^T
            resident((hidden, 1)),           # b2
            resident((state_dim, hidden)),   # W3^T
            resident((state_dim, 1)),        # b3
        ],
        out_specs=pl.BlockSpec((1, 8, 128), lambda c, i: (c, 0, 0)),
        scratch_shapes=[pltpu.VMEM((state_dim, batch_tile), jnp.float32)],
        compiler_params=pltpu.CompilerParams(
            dimension_semantics=("parallel", "arbitrary")),
    )(xa, tgt, w1t, b1c, w2t, b2c, w3t, b3c)

    # nn.MSELoss default 'mean' reduction: divide by the GLOBAL element count.
    # Only lane [0, 0] of each per-core block carries the (broadcast) partial.
    return jnp.sum(partials[:, 0, 0]) / (B * state_dim)


def _init_params(key, in_dim, hidden, out_dim):
    """Deterministic synthetic MLP parameters (no checkpoint loading)."""
    k1, k2, k3, k4, k5, k6 = jax.random.split(key, 6)
    scale = 0.1
    w1 = scale * jax.random.normal(k1, (in_dim, hidden), jnp.float32)
    b1 = scale * jax.random.normal(k2, (1, hidden), jnp.float32)
    w2 = scale * jax.random.normal(k3, (hidden, hidden), jnp.float32)
    b2 = scale * jax.random.normal(k4, (1, hidden), jnp.float32)
    w3 = scale * jax.random.normal(k5, (hidden, out_dim), jnp.float32)
    b3 = scale * jax.random.normal(k6, (1, out_dim), jnp.float32)
    return (w1, b1, w2, b2, w3, b3)


def _reference_loss(params, state, action, target_state):
    """Pure-JAX f32 reference (module-faithful) for correctness checking."""
    w1, b1, w2, b2, w3, b3 = params
    hi = jax.lax.Precision.HIGHEST
    x = jnp.concatenate([state, action], axis=-1)
    h1 = jnp.maximum(jnp.dot(x, w1, precision=hi) + b1, 0.0)
    h2 = jnp.maximum(jnp.dot(h1, w2, precision=hi) + b2, 0.0)
    pred = jnp.dot(h2, w3, precision=hi) + b3
    return jnp.mean((pred - target_state) ** 2)


if __name__ == "__main__":
    key = jax.random.PRNGKey(0)
    k_state, k_action, k_target, k_params, k_more = jax.random.split(key, 5)

    STATE_DIM = 3   # planar-pushing state (x, y, theta)
    ACTION_DIM = 3  # planar-pushing action
    HIDDEN = 32

    params = _init_params(k_params, STATE_DIM + ACTION_DIM, HIDDEN, STATE_DIM)

    # Case 1: tiny batch (B=2), bf16 MXU path (compare with bf16 tolerance).
    B = 2
    state = jax.random.normal(k_state, (B, STATE_DIM), jnp.float32)
    action = jax.random.normal(k_action, (B, ACTION_DIM), jnp.float32)
    target_state = jax.random.normal(k_target, (B, STATE_DIM), jnp.float32)

    ref = _reference_loss(params, state, action, target_state)

    loss_bf16 = jax.block_until_ready(
        single_step_loss(params, state, action, target_state))
    assert jnp.allclose(loss_bf16, ref, rtol=2e-2, atol=2e-2), (loss_bf16, ref)

    # f32-everything variant: tighter check that layout / indexing are exact.
    loss_f32 = jax.block_until_ready(
        single_step_loss(params, state, action, target_state,
                         compute_dtype=jnp.float32))
    assert jnp.allclose(loss_f32, ref, rtol=5e-3, atol=1e-4), (loss_f32, ref)

    # Case 2: multi-tile batch with a remainder (exercises the accumulator
    # grid axis, the deferred finalize reduce and the static padding mask).
    B2 = 300
    ks2, ka2, kt2 = jax.random.split(k_more, 3)
    state2 = jax.random.normal(ks2, (B2, STATE_DIM), jnp.float32)
    action2 = jax.random.normal(ka2, (B2, ACTION_DIM), jnp.float32)
    target2 = jax.random.normal(kt2, (B2, STATE_DIM), jnp.float32)

    ref2 = _reference_loss(params, state2, action2, target2)
    loss2 = jax.block_until_ready(
        single_step_loss(params, state2, action2, target2, batch_tile=128))
    assert jnp.allclose(loss2, ref2, rtol=2e-2, atol=2e-2), (loss2, ref2)

    print("KERNEL_OK")
</pallas_src>

<mosaic_0001>
module attributes {stable_mosaic.version = 11 : i64} {
  func.func @_single_step_loss_kernel(%arg0: i32, %arg1: i32, %arg2: memref<6x128xbf16, #tpu.memory_space<vmem>>, %arg3: memref<3x128xf32, #tpu.memory_space<vmem>>, %arg4: memref<32x6xbf16, #tpu.memory_space<vmem>>, %arg5: memref<32x1xf32, #tpu.memory_space<vmem>>, %arg6: memref<32x32xbf16, #tpu.memory_space<vmem>>, %arg7: memref<32x1xf32, #tpu.memory_space<vmem>>, %arg8: memref<3x32xbf16, #tpu.memory_space<vmem>>, %arg9: memref<3x1xf32, #tpu.memory_space<vmem>>, %arg10: memref<1x8x128xf32, #tpu.memory_space<vmem>>, %arg11: memref<3x128xf32, #tpu.memory_space<vmem>>) attributes {dimension_semantics = [#tpu.dimension_semantics<parallel>, #tpu.dimension_semantics<arbitrary>], iteration_bounds = array<i64: 1, 1>, scalar_prefetch = 0 : i64, scratch_operands = 1 : i64, tpu.core_type = #tpu.core_type<tc>, window_params = [{transform_indices = @transform_0, window_bounds = array<i64: 6, 128>}, {transform_indices = @transform_1, window_bounds = array<i64: 3, 128>}, {pipeline_mode = #tpu.pipeline_mode<synchronous>, transform_indices = @transform_2, window_bounds = array<i64: 32, 6>}, {pipeline_mode = #tpu.pipeline_mode<synchronous>, transform_indices = @transform_3, window_bounds = array<i64: 32, 1>}, {pipeline_mode = #tpu.pipeline_mode<synchronous>, transform_indices = @transform_4, window_bounds = array<i64: 32, 32>}, {pipeline_mode = #tpu.pipeline_mode<synchronous>, transform_indices = @transform_5, window_bounds = array<i64: 32, 1>}, {pipeline_mode = #tpu.pipeline_mode<synchronous>, transform_indices = @transform_6, window_bounds = array<i64: 3, 32>}, {pipeline_mode = #tpu.pipeline_mode<synchronous>, transform_indices = @transform_7, window_bounds = array<i64: 3, 1>}, {transform_indices = @transform_8, window_bounds = array<i64: 1, 8, 128>}]} {
    %c0_i32 = arith.constant 0 : i32
    %0 = arith.cmpi eq, %arg1, %c0_i32 : i32
    %1 = arith.extui %0 : i1 to i32
    %c0_i32_0 = arith.constant 0 : i32
    %2 = arith.cmpi ne, %1, %c0_i32_0 : i32
    scf.if %2 {
      %cst_27 = arith.constant 0.000000e+00 : f32
      %44 = vector.broadcast %cst_27 : f32 to vector<1x8x128xf32>
      %c0_28 = arith.constant 0 : index
      %c0_29 = arith.constant 0 : index
      %c0_30 = arith.constant 0 : index
      %45 = vector.load %arg10[%c0_28, %c0_29, %c0_30] : memref<1x8x128xf32, #tpu.memory_space<vmem>>, vector<1x8x128xf32>
      tpu.vector_store %arg10[%c0_28, %c0_29, %c0_30], %44 {strides = array<i32>} : memref<1x8x128xf32, #tpu.memory_space<vmem>>, vector<1x8x128xf32>,
      %cst_31 = arith.constant 0.000000e+00 : f32
      %46 = vector.broadcast %cst_31 : f32 to vector<3x128xf32>
      %c0_32 = arith.constant 0 : index
      %c0_33 = arith.constant 0 : index
      %47 = vector.load %arg11[%c0_32, %c0_33] : memref<3x128xf32, #tpu.memory_space<vmem>>, vector<3x128xf32>
      tpu.vector_store %arg11[%c0_32, %c0_33], %46 {strides = array<i32>} : memref<3x128xf32, #tpu.memory_space<vmem>>, vector<3x128xf32>,
    } else {
    }
    %c0 = arith.constant 0 : index
    %c0_1 = arith.constant 0 : index
    %3 = vector.load %arg4[%c0, %c0_1] : memref<32x6xbf16, #tpu.memory_space<vmem>>, vector<32x6xbf16>
    %c0_2 = arith.constant 0 : index
    %c0_3 = arith.constant 0 : index
    %4 = vector.load %arg2[%c0_2, %c0_3] : memref<6x128xbf16, #tpu.memory_space<vmem>>, vector<6x128xbf16>
    %cst = arith.constant dense<0.000000e+00> : vector<32x128xf32>
    %5 = tpu.matmul %3, %4, %cst {dimension_numbers = #tpu.dot_dimension_numbers<[1], [0], [0], [1], [0, 0, 1, 1], [], []>} : vector<32x6xbf16>, vector<6x128xbf16>, vector<32x128xf32> -> vector<32x128xf32>
    %c0_4 = arith.constant 0 : index
    %c0_5 = arith.constant 0 : index
    %6 = vector.load %arg5[%c0_4, %c0_5] : memref<32x1xf32, #tpu.memory_space<vmem>>, vector<32x1xf32>
    %7 = vector.broadcast %6 : vector<32x1xf32> to vector<32x128xf32>
    %8 = arith.addf %5, %7 : vector<32x128xf32>
    %cst_6 = arith.constant 0.000000e+00 : f32
    %9 = vector.broadcast %cst_6 : f32 to vector<32x128xf32>
    %10 = arith.maximumf %8, %9 : vector<32x128xf32>
    %c0_7 = arith.constant 0 : index
    %c0_8 = arith.constant 0 : index
    %11 = vector.load %arg6[%c0_7, %c0_8] : memref<32x32xbf16, #tpu.memory_space<vmem>>, vector<32x32xbf16>
    %12 = arith.truncf %10 : vector<32x128xf32> to vector<32x128xbf16>
    %cst_9 = arith.constant dense<0.000000e+00> : vector<32x128xf32>
    %13 = tpu.matmul %11, %12, %cst_9 {dimension_numbers = #tpu.dot_dimension_numbers<[1], [0], [0], [1], [0, 0, 1, 1], [], []>} : vector<32x32xbf16>, vector<32x128xbf16>, vector<32x128xf32> -> vector<32x128xf32>
    %c0_10 = arith.constant 0 : index
    %c0_11 = arith.constant 0 : index
    %14 = vector.load %arg7[%c0_10, %c0_11] : memref<32x1xf32, #tpu.memory_space<vmem>>, vector<32x1xf32>
    %15 = vector.broadcast %14 : vector<32x1xf32> to vector<32x128xf32>
    %16 = arith.addf %13, %15 : vector<32x128xf32>
    %cst_12 = arith.constant 0.000000e+00 : f32
    %17 = vector.broadcast %cst_12 : f32 to vector<32x128xf32>
    %18 = arith.maximumf %16, %17 : vector<32x128xf32>
    %c0_13 = arith.constant 0 : index
    %c0_14 = arith.constant 0 : index
    %19 = vector.load %arg8[%c0_13, %c0_14] : memref<3x32xbf16, #tpu.memory_space<vmem>>, vector<3x32xbf16>
    %20 = arith.truncf %18 : vector<32x128xf32> to vector<32x128xbf16>
    %cst_15 = arith.constant dense<0.000000e+00> : vector<3x128xf32>
    %21 = tpu.matmul %19, %20, %cst_15 {dimension_numbers = #tpu.dot_dimension_numbers<[1], [0], [0], [1], [0, 0, 1, 1], [], []>} : vector<3x32xbf16>, vector<32x128xbf16>, vector<3x128xf32> -> vector<3x128xf32>
    %c0_16 = arith.constant 0 : index
    %c0_17 = arith.constant 0 : index
    %22 = vector.load %arg9[%c0_16, %c0_17] : memref<3x1xf32, #tpu.memory_space<vmem>>, vector<3x1xf32>
    %23 = vector.broadcast %22 : vector<3x1xf32> to vector<3x128xf32>
    %24 = arith.addf %21, %23 : vector<3x128xf32>
    %c0_18 = arith.constant 0 : index
    %c0_19 = arith.constant 0 : index
    %25 = vector.load %arg3[%c0_18, %c0_19] : memref<3x128xf32, #tpu.memory_space<vmem>>, vector<3x128xf32>
    %26 = arith.subf %24, %25 : vector<3x128xf32>
    %27 = arith.mulf %26, %26 : vector<3x128xf32>
    %28 = tpu.iota {dimensions = array<i32: 1>} : vector<3x128xi32>
    %c1_i32 = arith.constant 1 : i32
    %29 = arith.muli %arg0, %c1_i32 : i32
    %30 = arith.addi %29, %arg1 : i32
    %c128_i32 = arith.constant 128 : i32
    %31 = arith.muli %30, %c128_i32 : i32
    %32 = vector.broadcast %31 : i32 to vector<3x128xi32>
    %33 = arith.addi %28, %32 : vector<3x128xi32>
    %c2_i32 = arith.constant 2 : i32
    %34 = vector.broadcast %c2_i32 : i32 to vector<3x128xi32>
    %35 = arith.cmpi slt, %33, %34 : vector<3x128xi32>
    %cst_20 = arith.constant 0.000000e+00 : f32
    %36 = vector.broadcast %cst_20 : f32 to vector<3x128xf32>
    %37 = arith.select %35, %27, %36 : vector<3x128xi1>, vector<3x128xf32>
    %c0_21 = arith.constant 0 : index
    %c0_22 = arith.constant 0 : index
    %38 = vector.load %arg11[%c0_21, %c0_22] : memref<3x128xf32, #tpu.memory_space<vmem>>, vector<3x128xf32>
    %39 = arith.addf %38, %37 : vector<3x128xf32>
    %c0_23 = arith.constant 0 : index
    %c0_24 = arith.constant 0 : index
    %40 = vector.load %arg11[%c0_23, %c0_24] : memref<3x128xf32, #tpu.memory_space<vmem>>, vector<3x128xf32>
    tpu.vector_store %arg11[%c0_23, %c0_24], %39 {strides = array<i32>} : memref<3x128xf32, #tpu.memory_space<vmem>>, vector<3x128xf32>,
    %c0_i32_25 = arith.constant 0 : i32
    %41 = arith.cmpi eq, %arg1, %c0_i32_25 : i32
    %42 = arith.extui %41 : i1 to i32
    %c0_i32_26 = arith.constant 0 : i32
    %43 = arith.cmpi ne, %42, %c0_i32_26 : i32
    scf.if %43 {
      %c0_27 = arith.constant 0 : index
      %c0_28 = arith.constant 0 : index
      %c0_29 = arith.constant 0 : index
      %44 = vector.load %arg10[%c0_27, %c0_28, %c0_29] : memref<1x8x128xf32, #tpu.memory_space<vmem>>, vector<1x8x128xf32>
      %c0_30 = arith.constant 0 : index
      %c0_31 = arith.constant 0 : index
      %45 = vector.load %arg11[%c0_30, %c0_31] : memref<3x128xf32, #tpu.memory_space<vmem>>, vector<3x128xf32>
      %46 = vector.shape_cast %45 : vector<3x128xf32> to vector<1x3x128xf32>
      %cst_32 = arith.constant dense<0.000000e+00> : vector<1xf32>
      %47 = vector.multi_reduction <add>, %46, %cst_32 [1, 2] : vector<1x3x128xf32> to vector<1xf32>
      %48 = vector.shape_cast %47 : vector<1xf32> to vector<1x1x1xf32>
      %49 = vector.extract %48[0, 0, 0] : f32 from vector<1x1x1xf32>
      %50 = vector.broadcast %49 : f32 to vector<1x8x128xf32>
      %51 = arith.addf %44, %50 : vector<1x8x128xf32>
      %c0_33 = arith.constant 0 : index
      %c0_34 = arith.constant 0 : index
      %c0_35 = arith.constant 0 : index
      %52 = vector.load %arg10[%c0_33, %c0_34, %c0_35] : memref<1x8x128xf32, #tpu.memory_space<vmem>>, vector<1x8x128xf32>
      tpu.vector_store %arg10[%c0_33, %c0_34, %c0_35], %51 {strides = array<i32>} : memref<1x8x128xf32, #tpu.memory_space<vmem>>, vector<1x8x128xf32>,
    } else {
    }
    return
  }
  func.func @transform_0(%arg0: i32, %arg1: i32) -> (i32, i32) {
    %c1_i32 = arith.constant 1 : i32
    %0 = arith.muli %arg0, %c1_i32 : i32
    %1 = arith.addi %0, %arg1 : i32
    %c0_i32 = arith.constant 0 : i32
    %c0_i32_0 = arith.constant 0 : i32
    return %c0_i32, %1 : i32, i32
  }
  func.func @transform_1(%arg0: i32, %arg1: i32) -> (i32, i32) {
    %c1_i32 = arith.constant 1 : i32
    %0 = arith.muli %arg0, %c1_i32 : i32
    %1 = arith.addi %0, %arg1 : i32
    %c0_i32 = arith.constant 0 : i32
    %c0_i32_0 = arith.constant 0 : i32
    return %c0_i32, %1 : i32, i32
  }
  func.func @transform_2(%arg0: i32, %arg1: i32) -> (i32, i32) {
    %c0_i32 = arith.constant 0 : i32
    %c0_i32_0 = arith.constant 0 : i32
    %c0_i32_1 = arith.constant 0 : i32
    return %c0_i32, %c0_i32_0 : i32, i32
  }
  func.func @transform_3(%arg0: i32, %arg1: i32) -> (i32, i32) {
    %c0_i32 = arith.constant 0 : i32
    %c0_i32_0 = arith.constant 0 : i32
    %c0_i32_1 = arith.constant 0 : i32
    return %c0_i32, %c0_i32_0 : i32, i32
  }
  func.func @transform_4(%arg0: i32, %arg1: i32) -> (i32, i32) {
    %c0_i32 = arith.constant 0 : i32
    %c0_i32_0 = arith.constant 0 : i32
    %c0_i32_1 = arith.constant 0 : i32
    return %c0_i32, %c0_i32_0 : i32, i32
  }
  func.func @transform_5(%arg0: i32, %arg1: i32) -> (i32, i32) {
    %c0_i32 = arith.constant 0 : i32
    %c0_i32_0 = arith.constant 0 : i32
    %c0_i32_1 = arith.constant 0 : i32
    return %c0_i32, %c0_i32_0 : i32, i32
  }
  func.func @transform_6(%arg0: i32, %arg1: i32) -> (i32, i32) {
    %c0_i32 = arith.constant 0 : i32
    %c0_i32_0 = arith.constant 0 : i32
    %c0_i32_1 = arith.constant 0 : i32
    return %c0_i32, %c0_i32_0 : i32, i32
  }
  func.func @transform_7(%arg0: i32, %arg1: i32) -> (i32, i32) {
    %c0_i32 = arith.constant 0 : i32
    %c0_i32_0 = arith.constant 0 : i32
    %c0_i32_1 = arith.constant 0 : i32
    return %c0_i32, %c0_i32_0 : i32, i32
  }
  func.func @transform_8(%arg0: i32, %arg1: i32) -> (i32, i32, i32) {
    %c0_i32 = arith.constant 0 : i32
    %c0_i32_0 = arith.constant 0 : i32
    %c0_i32_1 = arith.constant 0 : i32
    return %arg0, %c0_i32, %c0_i32_0 : i32, i32, i32
  }
}

</mosaic_0001>

<bundles_post_ra>
// kernel: tpu_custom_call.1
= control target key start
LH: loop header
LB: loop body
LE: loop exit
PB: predicated region body
PF: predicated region fallthrough
CT: control target
= control target key end

     0   :  { %vm117_vm0 = vcmask 1042432   ;;  %vm110_vm1 = vcmask 48128   ;;  %v460_v5 = vmov 0   ;;  %s566_s0 = inlined_call_operand.vmem [shape: bf16[6,128], index: 0, kind: input, shape index: {}]   ;;  %s567_s1 = inlined_call_operand.vmem [shape: f32[3,128], index: 1, kind: input, shape index: {}]   ;;  %s568_s2 = inlined_call_operand.vmem [shape: bf16[32,6], index: 2, kind: input, shape index: {}]   ;;  %s569_s3 = inlined_call_operand.vmem [shape: f32[32,1], index: 3, kind: input, shape index: {}]   ;;  %s570_s4 = inlined_call_operand.vmem [shape: bf16[32,32], index: 4, kind: input, shape index: {}]   ;;  %s571_s5 = inlined_call_operand.vmem [shape: f32[32,1], index: 5, kind: input, shape index: {}]   ;;  %s572_s6 = inlined_call_operand.vmem [shape: bf16[3,32], index: 6, kind: input, shape index: {}]   ;;  %s573_s7 = inlined_call_operand.vmem [shape: f32[3,1], index: 7, kind: input, shape index: {}]   ;;  %s574_s8 = inlined_call_operand.hbm [shape: f32[1,8,128], index: 8, kind: output, shape index: {}]  }
   0x1   :  { %v75_v0 = vld [vmem:[%s566_s0] sm:$0x7]  ;;  %v435_v3 = vld [vmem:[%s568_s2 + $0x8] sm:$0xff]   ;;  %v78_v4 = vld [vmem:[%s569_s3 + $0x10] sm:$0xff]  ;;  %432 = vset.pattern.permute.xlu0 %v460_v5  ;;  %433 = vset.pattern.permute.xlu1 %v460_v5 }
   0x2   :  { %v434_v1 = vld [vmem:[%s568_s2] sm:$0xff]   ;;  %425 = vmatprep.subr.msk.bf16.mxu0 %vm117_vm0, %v75_v0  ;;  %v119_v2 = vsel %vm117_vm0, %v75_v0, 0  ;;  %92 = vperm.xlu0 %432, %v78_v4   ;;  %v79_v7 = vld [vmem:[%s569_s3 + $0x18] sm:$0xff]  ;;  %v77_v8 = vld [vmem:[%s569_s3 + $0x8] sm:$0xff] }
   0x3   :  { %404 = vmatpush3.bf16.msra.mxu0 %v119_v2  ;;  %405 = vmatprep.mubr.msk.bf16.mxu0 %vm110_vm1, %v434_v1  ;;  %v76_v6 = vld [vmem:[%s569_s3] sm:$0xff] }
   0x4   :  { %82 = vperm.xlu1 %433, %v76_v6  }
   0x6   :  { %406 = vmatmul.mubr.msk.bf16.vlgmr.msra.gmra.mxu0 %vm110_vm1, %v435_v3 }
   0x7   :  { %13 = vsyncpa [#allocation4], 0  ;;  %97 = vperm.xlu0 %432, %v79_v7   ;;  %v182_v9 = vld [vmem:[%s571_s5 + $0x10] sm:$0xff]  ;;  %v183_v10 = vld [vmem:[%s571_s5 + $0x18] sm:$0xff]  ;;  %vm214_vm2 = vcmask 261120   ;;  %v461_v34 = vmov 0.0   ;;  %v329_v54 = vlaneseq }
   0x8   :  { %87 = vperm.xlu1 %433, %v77_v8   ;;  %v180_v11 = vld [vmem:[%s571_s5] sm:$0xff]  ;;  %v181_v12 = vld [vmem:[%s571_s5 + $0x8] sm:$0xff]  ;;  %417 = vmatprep.subr.bf16.mxu0 %v461_v34  ;;  %70 = vst [vmem:[#allocation2] sm:$0x7] %v461_v34  ;;  %vm462_vm3 = vmmov 0  }
   0x9   :  { %v277_v13 = vld [vmem:[%s573_s7] sm:$0x7]  ;;  %v437_v33 = vld [vmem:[%s570_s4 + $0x8] sm:$0xff]   ;;  %421 = vmatprep.mubr.msk.bf16.mxu0 %vm462_vm3, %v461_v34  ;;  %v330_v58 = vand.u32 127, %v329_v54 }
   0xa   :  { %v436_v14 = vld [vmem:[%s570_s4] sm:$0xff]  }
   0xb   :  { %196 = vperm.xlu0 %432, %v182_v9   ;;  %413 = vmatprep.mubr.msk.bf16.mxu1 %vm214_vm2, %v436_v14  ;;  %v274_v53 = vld [vmem:[%s572_s6] sm:$0x3]  ;;  %vm335_vm4 = vcmp.lt.s32.totalorder %v330_v58, 2 }
   0xc   :  { %201 = vperm.xlu1 %433, %v183_v10   ;;  %v326_v57 = vld [vmem:[%s567_s1] sm:$0x7]  ;;  %s463_s1 = smov [#allocation3]  }
   0xd   :  { %s364_s6 = sshll.u32 %s463_s1, 4  ;;  %s365_s6 = int_to_ptr.vmem [resolvable:$true] %s364_s6 }
   0xe   :  { %s438_s10 = scalar_lea.vmem %s365_s6, 128  ;;  %p443_p1 = scmp.lt.s32.totalorder %s365_s6, %s365_s6 }
   0xf   :  { %186 = vperm.xlu0 %432, %v180_v11   ;;  %v337_v0 = vld [vmem:[#allocation2] sm:$0x7]  ;;  %p439_p0 = scmp.ne.s32.totalorder %s365_s6, %s438_s10  ;;  %p444_p2 = scmp.lt.s32.totalorder %s438_s10, %s438_s10 }
  0x10   :  { %191 = vperm.xlu1 %433, %v181_v12  }
  0x11   :  { %p445_p3 = por %p444_p2, %p443_p1 }
  0x13   :  { %280 = vperm.xlu0 %432, %v277_v13   ;;  %p446_p4 = pnand %p445_p3, %p439_p0 }
  0x7d   :  { %v93_v15 = vpop.permute.xlu0 %92 }
  0x7f   :  { %v83_v16 = vpop.permute.xlu1 %82 }
  0x82   :  { %v98_v20 = vpop.permute.xlu0 %97 }
  0x83   :  { %v88_v24 = vpop.permute.xlu1 %87 }
  0x86   :  { %v197_v35 = vpop.permute.xlu0 %196 }
  0x87   :  { %v202_v36 = vpop.permute.xlu1 %201 }
  0x8a   :  { %v187_v41 = vpop.permute.xlu0 %186 }
  0x8b   :  { %v192_v43 = vpop.permute.xlu1 %191 }
  0x8e   :  { %v281_v55 = vpop.permute.xlu0 %280 }
  0xc6   :  { %v407_v17 = vpop.f32.mrf.mxu0 }
  0xc7   :  { %v164_v19 = vadd.f32 %v407_v17, %v93_v15 }
  0xc8   :  { %v155_v18 = vpop.f32.mrf.mxu0 }
  0xc9   :  { %v156_v22 = vadd.f32 %v155_v18, %v83_v16  ;;  %v172_v26 = vmax.f32 %v164_v19, 0.0 }
  0xca   :  { %v408_v21 = vpop.f32.mrf.mxu0 }
  0xcb   :  { %v167_v23 = vadd.f32 %v408_v21, %v98_v20  ;;  %v170_v29 = vmax.f32 %v156_v22, 0.0 }
  0xcc   :  { %v158_v25 = vpop.f32.mrf.mxu0 }
  0xcd   :  { %v173_v27 = vmax.f32 %v167_v23, 0.0  ;;  %v159_v28 = vadd.f32 %v158_v25, %v88_v24 }
  0xcf   :  { %v171_v30 = vmax.f32 %v159_v28, 0.0  ;;  %v179_v31 = vpack.c.bf16 %v173_v27, %v172_v26 }
  0xd1   :  { %v178_v32 = vpack.c.bf16 %v171_v30, %v170_v29  ;;  %409 = vmatprep.subr.bf16.mxu1 %v179_v31 }
  0xd2   :  { %410 = vmatpush3.bf16.msra.mxu1 %v179_v31 }
  0xd3   :  { %411 = vmatprep.subr.bf16.mxu1 %v178_v32 }
  0xd6   :  { %412 = vmatpush3.bf16.msra.mxu1 %v178_v32 }
  0xd9   :  { %414 = vmatmul.mubr.msk.bf16.vlgmr.msra.gmra.mxu1 %vm214_vm2, %v437_v33 }
 0x199   :  { %v415_v37 = vpop.f32.mrf.mxu1 }
 0x19a   :  { %v264_v39 = vadd.f32 %v415_v37, %v197_v35 }
 0x19b   :  { %v255_v38 = vpop.f32.mrf.mxu1 }
 0x19c   :  { %v272_v45 = vmax.f32 %v264_v39, 0.0  ;;  %v256_v46 = vadd.f32 %v255_v38, %v187_v41 }
 0x19d   :  { %v416_v40 = vpop.f32.mrf.mxu1 }
 0x19e   :  { %v267_v42 = vadd.f32 %v416_v40, %v202_v36  ;;  %v270_v51 = vmax.f32 %v256_v46, 0.0 }
 0x19f   :  { %v258_v44 = vpop.f32.mrf.mxu1 }
 0x1a0   :  { %v273_v47 = vmax.f32 %v267_v42, 0.0  ;;  %v259_v48 = vadd.f32 %v258_v44, %v192_v43 }
 0x1a2   :  { %v276_v49 = vpack.c.bf16 %v273_v47, %v272_v45  ;;  %v271_v50 = vmax.f32 %v259_v48, 0.0 }
 0x1a4   :  { %418 = vmatpush3.bf16.msra.mxu0 %v276_v49  ;;  %v275_v52 = vpack.c.bf16 %v271_v50, %v270_v51 }
 0x1a5   :  { %419 = vmatprep.subr.bf16.mxu0 %v461_v34 }
 0x1a8   :  { %420 = vmatpush3.bf16.msra.mxu0 %v275_v52 }
 0x1ab   :  { %422 = vmatmul.mubr.msk.bf16.vlgmr.msra.gmra.mxu0 %vm214_vm2, %v274_v53 }
 0x26b   :  { %v320_v56 = vpop.f32.mrf.mxu0 }
 0x26c   :  { %v321_v59 = vadd.f32 %v320_v56, %v281_v55 }
 0x26d   :  { %v423_v60 = vpop.f32.mrf.mxu0 }
 0x26e   :  { %v327_v61 = vsub.f32 %v321_v59, %v326_v57 }
 0x26f   :  { %v323_v62 = vpop.f32.mrf.mxu0 }
 0x270   :  { %v328_v63 = vmul.f32 %v327_v61, %v327_v61 }
 0x271   :  { %v424_v1 = vpop.f32.mrf.mxu0 }
 0x272   :  { %v336_v2 = vsel %vm335_vm4, %v328_v63, 0.0 }
 0x273   :  { %v338_v3 = vadd.f32 %v337_v0, %v336_v2 }
 0x275   :  { %339 = vst [vmem:[#allocation2] sm:$0x7] %v338_v3 }
 0x27c   :  { %v344_v4 = vld [vmem:[#allocation2] sm:$0x7] }
 0x27d   :  { %v345_v5 = vsel %vm117_vm0, %v344_v4, 0.0 }
 0x27e   :  { %346 = vadd.xlane.f32.xlu1 %v345_v5 }
 0x307   :  { %v347_v6 = vpop.xlane.xlu1 %346 }
 0x308   :  { %v348_v7 = vrot.slane %v347_v6, 4 }
 0x30a   :  { %v349_v8 = vadd.f32 %v348_v7, %v347_v6 }
 0x30c   :  { %v350_v9 = vrot.slane %v349_v8, 2 }
 0x30e   :  { %v351_v10 = vadd.f32 %v350_v9, %v349_v8 }
 0x310   :  { %v352_v11 = vrot.slane %v351_v10, 1 }
 0x312   :  { %v353_v12 = vadd.f32 %v352_v11, %v351_v10 }
 0x314   :  { %426 = vpush %v353_v12 }
 0x345   :  { %s427_s9 = spop %426 }
 0x346   :  { %v355_v13 = vstv %s427_s9 }
 0x347   :  { %357 = vst [vmem:[#allocation3] sm:$0xff] %v355_v13 }
 0x348   :  { %449 = shalt.err (!%p446_p4)
}
 0x349   :  { %367 = dma.vmem_to_hbm [thread:$0]  %s365_s6, 128, %s574_s8, [#allocation4]  }
 0x34a   :  { %458 = dma.done.wait [#allocation4], 128  }
 0x34b   :  { %459 = vsyncadd [#allocation4], 4294967168 }
 0x34c   :  { %371 = vsyncpa [#allocation4], 1 }

</bundles_post_ra>
